<compile_context>
chip_gen: v7x
topology: tpu7x:2x2x1
jax: 0.10.0
libtpu: 0.0.40
codegen_flags: <defaults>
</compile_context>

<pallas_src>
import jax
import jax.numpy as jnp
from jax.experimental import pallas as pl
from jax.experimental.pallas import tpu as pltpu


# ----------------------------------------------------------------------------
# Glue: class-weight schedule (identical to the PyTorch reference code).
# ----------------------------------------------------------------------------
def get_weight_class_list(split):
    the_split = split["split"]
    num_classes = split["num_classes"]
    cls_num = num_classes
    if the_split == "xset_train":
        skeleton_max = 400
        imb_factor = 0.01
    elif the_split == "train":
        skeleton_max = 100
        imb_factor = 0.1
    else:
        skeleton_max = 600
        imb_factor = 0.01
    skeleton_num_per_cls = []
    for cls_idx in range(cls_num):
        num = skeleton_max * imb_factor ** (cls_idx / (cls_num - 1.0))
        skeleton_num_per_cls.append(int(num))
    the_sum = sum(skeleton_num_per_cls)
    class_prob = []
    for cls_idx in range(cls_num):
        prob = the_sum / skeleton_num_per_cls[cls_idx]
        class_prob.append(prob)
    return class_prob


def twostage_weight(epoch, split):
    """DRW schedule: betas=[0,1], step_epoch=20 (as in the module __init__)."""
    step_epoch = 20
    betas = [0, 1]
    prob = get_weight_class_list(split)
    idx = (epoch + 1) // step_epoch
    beta = betas[idx]
    if beta == 0:
        prob = [1.0 for _ in prob]
    return jnp.asarray(prob, dtype=jnp.float32)


# ----------------------------------------------------------------------------
# Pallas kernel: weighted cross-entropy (mean reduction, PyTorch convention),
# tiled over the batch dimension with SMEM (num, den) accumulators.
# ----------------------------------------------------------------------------
def _make_weighted_ce_kernel(n_total, tile_n):
    def kernel(logits_ref, target_ref, weight_ref, loss_ref, acc_ref):
        i = pl.program_id(0)

        @pl.when(i == 0)
        def _init():
            acc_ref[0] = jnp.float32(0.0)
            acc_ref[1] = jnp.float32(0.0)

        x = logits_ref[...].astype(jnp.float32)        # (T, C)
        t = target_ref[...]                            # (T, 1) int32
        w = weight_ref[...].astype(jnp.float32)        # (1, C)

        # Row validity for the (possibly partial) last tile: rows past n_total
        # hold unspecified stale VMEM data and must drop out of num AND den.
        row = jax.lax.broadcasted_iota(jnp.int32, (x.shape[0], 1), 0) + i * tile_n
        valid = row < n_total                          # (T, 1) bool

        # Numerically stable log-sum-exp: one exp (EUP) + one log, lane
        # reductions on the XLU.  Sanitize invalid rows (could be NaN/Inf from
        # garbage data) with a select so 0*NaN never leaks into the sum.
        m = jnp.max(x, axis=-1, keepdims=True)                            # (T, 1)
        lse = m + jnp.log(jnp.sum(jnp.exp(x - m), axis=-1, keepdims=True))
        lse = jnp.where(valid, lse, 0.0)

        # One mask drives both gathers.  Out-of-range targets give an all-False
        # row (w_t = 0) and drop out of numerator and denominator, matching the
        # batch-padding/ignore behaviour.
        col = jax.lax.broadcasted_iota(jnp.int32, x.shape, 1)             # (T, C)
        mask = (col == t) & valid                                         # (T, C)

        x_t = jnp.sum(jnp.where(mask, x, 0.0), axis=-1, keepdims=True)    # logit[target]
        w_t = jnp.sum(jnp.where(mask, w, 0.0), axis=-1, keepdims=True)    # weight[target]

        acc_ref[0] = acc_ref[0] + jnp.sum(w_t * (lse - x_t))
        acc_ref[1] = acc_ref[1] + jnp.sum(w_t)

        @pl.when(i == pl.num_programs(0) - 1)
        def _finalize():
            loss_ref[0, 0] = acc_ref[0] / acc_ref[1]

    return kernel


_SUBLANES = 8


def _choose_tile_n(c, itemsize):
    # Keep the double-buffered logits tile under ~16 MiB total so VMEM use sits
    # comfortably inside the 32 MiB scoped limit we request (and under v7x's
    # 64 MiB physical VMEM).  For small class counts the cap of 4096 rows
    # dominates, which keeps the ~0.35 us per-grid-step overhead well amortized.
    budget = 8 * 1024 * 1024  # per single buffer
    t = budget // (2 * c * itemsize)
    return int(max(_SUBLANES, min(4096, (t // _SUBLANES) * _SUBLANES)))


def weighted_cross_entropy_pallas(logits, target, weight, *, tile_n=None):
    """logits: (N, C) float (f32 or bf16), target: (N,) int, weight: (C,) float -> f32 scalar."""
    n, c = logits.shape
    if not jnp.issubdtype(logits.dtype, jnp.floating):
        logits = logits.astype(jnp.float32)

    if tile_n is None:
        tile_n = _choose_tile_n(c, logits.dtype.itemsize)
    if n <= tile_n:
        tile_n = n                                   # single full-extent block
    else:
        tile_n = max(_SUBLANES, (tile_n // _SUBLANES) * _SUBLANES)
    n_tiles = pl.cdiv(n, tile_n)

    target_2d = target.reshape(n, 1).astype(jnp.int32)
    weight_2d = weight.reshape(1, c).astype(jnp.float32)

    # TODO(synk): on v7x, split the batch across the 2 TensorCores with a
    # leading 'parallel' grid axis emitting per-core (num, den) partials.
    loss = pl.pallas_call(
        _make_weighted_ce_kernel(n, tile_n),
        out_shape=jax.ShapeDtypeStruct((1, 1), jnp.float32),
        grid_spec=pltpu.PrefetchScalarGridSpec(
            num_scalar_prefetch=0,
            grid=(n_tiles,),
            in_specs=[
                pl.BlockSpec((tile_n, c), lambda i: (i, 0)),
                pl.BlockSpec((tile_n, 1), lambda i: (i, 0)),
                # constant block index -> weight fetched once, stays resident
                pl.BlockSpec((1, c), lambda i: (0, 0)),
            ],
            out_specs=pl.BlockSpec(memory_space=pltpu.MemorySpace.SMEM),
            scratch_shapes=[pltpu.SMEM((2,), jnp.float32)],
        ),
        compiler_params=pltpu.CompilerParams(
            dimension_semantics=("arbitrary",),      # accumulator-carrying axis
            vmem_limit_bytes=32 * 1024 * 1024,       # v5e default is only 16 MiB
        ),
    )(logits, target_2d, weight_2d)
    return loss[0, 0]


def twostage_weighted_loss(input, target, epoch, split, *, tile_n=None):
    """Mirrors TwostageWeightedLoss.forward(input, target, epoch, split)."""
    the_epoch = epoch["epoch"]
    weight = twostage_weight(the_epoch, split)
    return weighted_cross_entropy_pallas(input, target, weight, tile_n=tile_n)


# ----------------------------------------------------------------------------
if __name__ == "__main__":
    key = jax.random.PRNGKey(0)

    def ref_loss(logits, target, w):
        logp = jax.nn.log_softmax(logits.astype(jnp.float32), axis=-1)
        per = -jnp.take_along_axis(logp, target[:, None], axis=-1)[:, 0]
        return jnp.sum(w[target] * per) / jnp.sum(w[target])

    # --- small shape matching the module's forward: batch=8, 16 classes ------
    N, C = 8, 16
    k1, k2, k3, k4 = jax.random.split(key, 4)
    logits = jax.random.normal(k1, (N, C), dtype=jnp.float32)
    target = jax.random.randint(k2, (N,), 0, C, dtype=jnp.int32)
    split = {"split": "train", "num_classes": C}

    # stage 2: epoch 25 -> (25+1)//20 = 1 -> beta=1 -> imbalance class weights
    loss1 = twostage_weighted_loss(logits, target, {"epoch": 25}, split)
    jax.block_until_ready(loss1)
    w1 = twostage_weight(25, split)
    ref1 = ref_loss(logits, target, w1)
    assert jnp.allclose(loss1, ref1, rtol=1e-5, atol=1e-5), (loss1, ref1)

    # stage 1: epoch 5 -> beta=0 -> uniform weights == plain mean CE
    loss0 = twostage_weighted_loss(logits, target, {"epoch": 5}, split)
    jax.block_until_ready(loss0)
    ref0 = ref_loss(logits, target, jnp.ones((C,), jnp.float32))
    assert jnp.allclose(loss0, ref0, rtol=1e-5, atol=1e-5), (loss0, ref0)

    # --- multi-tile grid with a partial (masked) last tile -------------------
    N2 = 203  # not a multiple of the tile -> exercises the validity mask
    logits2 = jax.random.normal(k3, (N2, C), dtype=jnp.float32)
    target2 = jax.random.randint(k4, (N2,), 0, C, dtype=jnp.int32)
    loss2 = twostage_weighted_loss(logits2, target2, {"epoch": 25}, split, tile_n=64)
    jax.block_until_ready(loss2)
    ref2 = ref_loss(logits2, target2, w1)
    assert jnp.allclose(loss2, ref2, rtol=1e-5, atol=1e-5), (loss2, ref2)

    # bf16 logits pass straight through (no host-side f32 up-cast)
    loss_bf16 = twostage_weighted_loss(
        logits.astype(jnp.bfloat16), target, {"epoch": 25}, split
    )
    jax.block_until_ready(loss_bf16)

    print("KERNEL_OK")
</pallas_src>

<mosaic_0001>
module attributes {stable_mosaic.version = 11 : i64} {
  func.func @kernel(%arg0: i32, %arg1: memref<8x16xf32, #tpu.memory_space<vmem>>, %arg2: memref<8x1xi32, #tpu.memory_space<vmem>>, %arg3: memref<1x16xf32, #tpu.memory_space<vmem>>, %arg4: memref<1x1xf32, #tpu.memory_space<smem>>, %arg5: memref<2xf32, #tpu.memory_space<smem>>) attributes {dimension_semantics = [#tpu.dimension_semantics<arbitrary>], iteration_bounds = array<i64: 1>, scalar_prefetch = 0 : i64, scratch_operands = 1 : i64, tpu.core_type = #tpu.core_type<tc>, window_params = [{transform_indices = @transform_0, window_bounds = array<i64: 8, 16>}, {transform_indices = @transform_1, window_bounds = array<i64: 8, 1>}, {pipeline_mode = #tpu.pipeline_mode<synchronous>, transform_indices = @transform_2, window_bounds = array<i64: 1, 16>}, {transform_indices = @transform_3, window_bounds = array<i64: 1, 1>}]} {
    %c0_i32 = arith.constant 0 : i32
    %0 = arith.cmpi eq, %arg0, %c0_i32 : i32
    %1 = arith.extui %0 : i1 to i32
    %c0_i32_0 = arith.constant 0 : i32
    %2 = arith.cmpi ne, %1, %c0_i32_0 : i32
    scf.if %2 {
      %cst_20 = arith.constant 0.000000e+00 : f32
      %c0_21 = arith.constant 0 : index
      %57 = memref.load %arg5[%c0_21] : memref<2xf32, #tpu.memory_space<smem>>
      memref.store %cst_20, %arg5[%c0_21] : memref<2xf32, #tpu.memory_space<smem>>
      %cst_22 = arith.constant 0.000000e+00 : f32
      %c1_23 = arith.constant 1 : index
      %58 = memref.load %arg5[%c1_23] : memref<2xf32, #tpu.memory_space<smem>>
      memref.store %cst_22, %arg5[%c1_23] : memref<2xf32, #tpu.memory_space<smem>>
    } else {
    }
    %c0 = arith.constant 0 : index
    %c0_1 = arith.constant 0 : index
    %3 = vector.load %arg1[%c0, %c0_1] : memref<8x16xf32, #tpu.memory_space<vmem>>, vector<8x16xf32>
    %c0_2 = arith.constant 0 : index
    %c0_3 = arith.constant 0 : index
    %4 = vector.load %arg2[%c0_2, %c0_3] : memref<8x1xi32, #tpu.memory_space<vmem>>, vector<8x1xi32>
    %c0_4 = arith.constant 0 : index
    %c0_5 = arith.constant 0 : index
    %5 = vector.load %arg3[%c0_4, %c0_5] : memref<1x16xf32, #tpu.memory_space<vmem>>, vector<1x16xf32>
    %6 = tpu.iota {dimensions = array<i32: 0>} : vector<8x1xi32>
    %c8_i32 = arith.constant 8 : i32
    %7 = arith.muli %arg0, %c8_i32 : i32
    %8 = vector.broadcast %7 : i32 to vector<8x1xi32>
    %9 = arith.addi %6, %8 : vector<8x1xi32>
    %c8_i32_6 = arith.constant 8 : i32
    %10 = vector.broadcast %c8_i32_6 : i32 to vector<8x1xi32>
    %11 = arith.cmpi slt, %9, %10 : vector<8x1xi32>
    %cst = arith.constant dense<0xFF800000> : vector<8xf32>
    %12 = vector.multi_reduction <maximumf>, %3, %cst [1] : vector<8x16xf32> to vector<8xf32>
    %13 = vector.shape_cast %12 : vector<8xf32> to vector<8x1xf32>
    %14 = vector.broadcast %13 : vector<8x1xf32> to vector<8x16xf32>
    %15 = arith.subf %3, %14 : vector<8x16xf32>
    %16 = math.exp %15 : vector<8x16xf32>
    %cst_7 = arith.constant dense<0.000000e+00> : vector<8xf32>
    %17 = vector.multi_reduction <add>, %16, %cst_7 [1] : vector<8x16xf32> to vector<8xf32>
    %18 = vector.shape_cast %17 : vector<8xf32> to vector<8x1xf32>
    %19 = math.log %18 : vector<8x1xf32>
    %20 = arith.addf %13, %19 : vector<8x1xf32>
    %cst_8 = arith.constant 0.000000e+00 : f32
    %21 = vector.broadcast %cst_8 : f32 to vector<8x1xf32>
    %22 = arith.select %11, %20, %21 : vector<8x1xi1>, vector<8x1xf32>
    %23 = tpu.iota {dimensions = array<i32: 1>} : vector<8x16xi32>
    %24 = vector.broadcast %4 : vector<8x1xi32> to vector<8x16xi32>
    %25 = arith.cmpi eq, %23, %24 : vector<8x16xi32>
    %26 = vector.broadcast %11 : vector<8x1xi1> to vector<8x16xi1>
    %27 = arith.andi %25, %26 : vector<8x16xi1>
    %cst_9 = arith.constant 0.000000e+00 : f32
    %28 = vector.broadcast %cst_9 : f32 to vector<8x16xf32>
    %29 = arith.select %27, %3, %28 : vector<8x16xi1>, vector<8x16xf32>
    %cst_10 = arith.constant dense<0.000000e+00> : vector<8xf32>
    %30 = vector.multi_reduction <add>, %29, %cst_10 [1] : vector<8x16xf32> to vector<8xf32>
    %31 = vector.shape_cast %30 : vector<8xf32> to vector<8x1xf32>
    %cst_11 = arith.constant 0.000000e+00 : f32
    %32 = vector.shape_cast %5 : vector<1x16xf32> to vector<1x16xf32>
    %33 = vector.broadcast %32 : vector<1x16xf32> to vector<8x16xf32>
    %34 = vector.broadcast %cst_11 : f32 to vector<8x16xf32>
    %35 = arith.select %27, %33, %34 : vector<8x16xi1>, vector<8x16xf32>
    %cst_12 = arith.constant dense<0.000000e+00> : vector<8xf32>
    %36 = vector.multi_reduction <add>, %35, %cst_12 [1] : vector<8x16xf32> to vector<8xf32>
    %37 = vector.shape_cast %36 : vector<8xf32> to vector<8x1xf32>
    %c0_13 = arith.constant 0 : index
    %38 = memref.load %arg5[%c0_13] : memref<2xf32, #tpu.memory_space<smem>>
    %39 = arith.subf %22, %31 : vector<8x1xf32>
    %40 = arith.mulf %37, %39 : vector<8x1xf32>
    %41 = vector.shape_cast %40 : vector<8x1xf32> to vector<1x8x1xf32>
    %cst_14 = arith.constant dense<0.000000e+00> : vector<1xf32>
    %42 = vector.multi_reduction <add>, %41, %cst_14 [1, 2] : vector<1x8x1xf32> to vector<1xf32>
    %43 = vector.shape_cast %42 : vector<1xf32> to vector<1x1x1xf32>
    %44 = vector.extract %43[0, 0, 0] : f32 from vector<1x1x1xf32>
    %45 = arith.addf %38, %44 : f32
    %c0_15 = arith.constant 0 : index
    %46 = memref.load %arg5[%c0_15] : memref<2xf32, #tpu.memory_space<smem>>
    memref.store %45, %arg5[%c0_15] : memref<2xf32, #tpu.memory_space<smem>>
    %c1 = arith.constant 1 : index
    %47 = memref.load %arg5[%c1] : memref<2xf32, #tpu.memory_space<smem>>
    %48 = vector.shape_cast %37 : vector<8x1xf32> to vector<1x8x1xf32>
    %cst_16 = arith.constant dense<0.000000e+00> : vector<1xf32>
    %49 = vector.multi_reduction <add>, %48, %cst_16 [1, 2] : vector<1x8x1xf32> to vector<1xf32>
    %50 = vector.shape_cast %49 : vector<1xf32> to vector<1x1x1xf32>
    %51 = vector.extract %50[0, 0, 0] : f32 from vector<1x1x1xf32>
    %52 = arith.addf %47, %51 : f32
    %c1_17 = arith.constant 1 : index
    %53 = memref.load %arg5[%c1_17] : memref<2xf32, #tpu.memory_space<smem>>
    memref.store %52, %arg5[%c1_17] : memref<2xf32, #tpu.memory_space<smem>>
    %c0_i32_18 = arith.constant 0 : i32
    %54 = arith.cmpi eq, %arg0, %c0_i32_18 : i32
    %55 = arith.extui %54 : i1 to i32
    %c0_i32_19 = arith.constant 0 : i32
    %56 = arith.cmpi ne, %55, %c0_i32_19 : i32
    scf.if %56 {
      %c0_20 = arith.constant 0 : index
      %57 = memref.load %arg5[%c0_20] : memref<2xf32, #tpu.memory_space<smem>>
      %c1_21 = arith.constant 1 : index
      %58 = memref.load %arg5[%c1_21] : memref<2xf32, #tpu.memory_space<smem>>
      %59 = arith.divf %57, %58 : f32
      %c0_22 = arith.constant 0 : index
      %c0_23 = arith.constant 0 : index
      %60 = memref.load %arg4[%c0_22, %c0_23] : memref<1x1xf32, #tpu.memory_space<smem>>
      memref.store %59, %arg4[%c0_22, %c0_23] : memref<1x1xf32, #tpu.memory_space<smem>>
    } else {
    }
    return
  }
  func.func @transform_0(%arg0: i32) -> (i32, i32) {
    %c0_i32 = arith.constant 0 : i32
    %c0_i32_0 = arith.constant 0 : i32
    return %arg0, %c0_i32 : i32, i32
  }
  func.func @transform_1(%arg0: i32) -> (i32, i32) {
    %c0_i32 = arith.constant 0 : i32
    %c0_i32_0 = arith.constant 0 : i32
    return %arg0, %c0_i32 : i32, i32
  }
  func.func @transform_2(%arg0: i32) -> (i32, i32) {
    %c0_i32 = arith.constant 0 : i32
    %c0_i32_0 = arith.constant 0 : i32
    %c0_i32_1 = arith.constant 0 : i32
    return %c0_i32, %c0_i32_0 : i32, i32
  }
  func.func @transform_3(%arg0: i32) -> (i32, i32) {
    %c0_i32 = arith.constant 0 : i32
    %c0_i32_0 = arith.constant 0 : i32
    %c0_i32_1 = arith.constant 0 : i32
    return %c0_i32, %c0_i32_0 : i32, i32
  }
}

</mosaic_0001>

<bundles_post_ra>
// kernel: tpu_custom_call.1
= control target key start
LH: loop header
LB: loop body
LE: loop exit
PB: predicated region body
PF: predicated region fallthrough
CT: control target
= control target key end

     0   :  { %vm32_vm0 = vcmask 130048   ;;  %s201_s0 = inlined_call_operand.vmem [shape: f32[8,16], index: 0, kind: input, shape index: {}]   ;;  %s202_s1 = inlined_call_operand.vmem [shape: s32[8,1], index: 1, kind: input, shape index: {}]   ;;  %s203_s2 = inlined_call_operand.vmem [shape: f32[1,16], index: 2, kind: input, shape index: {}]   ;;  %s204_s3 = inlined_call_operand.hbm [shape: f32[1,1], index: 3, kind: output, shape index: {}]  }
   0x1   :  { %v23_v0 = vld [vmem:[%s201_s0] sm:$0xff] }
   0x2   :  { %8 = vsyncpa [#allocation4], 0  ;;  %v33_v1 = vsel %vm32_vm0, %v23_v0, -inf  ;;  %v154_v2 = vmov 0   ;;  %v24_v3 = vld [vmem:[%s202_s1] sm:$0xff]  ;;  %v46_v7 = vlaneseq  ;;  %vm72_vm2 = vcmask 7168  }
   0x3   :  { %135 = vset.pattern.permute.xlu0 %v154_v2  ;;  %v124_v13 = vld [vmem:[%s203_s2] ss:$0 sm:$0xff]  ;;  %s142_s21 = scalar_lea.hbm %s204_s3, 16 }
   0x4   :  { %34 = vmax.xlane.f32.xlu0 %v33_v1  ;;  %v47_v8 = vand.u32 127, %v46_v7  ;;  %p143_p0 = scmp.ne.s32.totalorder %s204_s3, %s142_s21  ;;  %p146_p1 = scmp.lt.u32.totalorder %s142_s21, %s204_s3 }
   0x6   :  { %p148_p2 = pnand %p146_p1, %p143_p0 }
  0x1a   :  { %49 = vperm.xlu0 %135, %v24_v3  }
  0x91   :  { %v35_v4 = vpop.xlane.xlu0 %34 }
  0x92   :  { %v36_v5 = vsub.f32 %v23_v0, %v35_v4 }
  0x94   :  { %v37_v6 = vmul.f32 1.442695, %v36_v5 }
  0x96   :  { %136 = vpow2.f32 %v37_v6 }
  0x99   :  { %v50_v9 = vpop.permute.xlu0 %49 }
  0x9a   :  { %vm51_vm1 = vcmp.eq.s32.totalorder %v47_v8, %v50_v9 }
  0x9b   :  { %v55_v11 = vsel %vm51_vm1, %v23_v0, 0.0  ;;  %v65_v15 = vsel %vm51_vm1, %v124_v13, 0.0 }
  0x9c   :  { %v56_v14 = vsel %vm32_vm0, %v55_v11, 0.0  ;;  %v66_v16 = vsel %vm32_vm0, %v65_v15, 0.0 }
  0xa0   :  { %v137_v10 = vpop.eup %136 }
  0xa1   :  { %v39_v12 = vsel %vm32_vm0, %v137_v10, 0.0 }
  0xa2   :  { %40 = vadd.xlane.f32.xlu1 %v39_v12 }
  0xa6   :  { %57 = vadd.xlane.f32.xlu1 %v56_v14 }
  0xaa   :  { %67 = vadd.xlane.f32.xlu1 %v66_v16 }
 0x12f   :  { %v41_v17 = vpop.xlane.xlu1 %40 }
 0x130   :  { %138 = vlog2.f32 %v41_v17 }
 0x133   :  { %v58_v19 = vpop.xlane.xlu1 %57 }
 0x137   :  { %v68_v23 = vpop.xlane.xlu1 %67 }
 0x138   :  { %v87_v26 = vsel %vm72_vm2, %v68_v23, 0.0 }
 0x13a   :  { %v139_v18 = vpop.eup %138 }
 0x13b   :  { %v43_v20 = vmul.f32 0.6931472, %v139_v18 }
 0x13d   :  { %v44_v21 = vadd.f32 %v43_v20, %v35_v4 }
 0x13f   :  { %v70_v22 = vsub.f32 %v44_v21, %v58_v19 }
 0x141   :  { %v71_v24 = vmul.f32 %v70_v22, %v68_v23 }
 0x143   :  { %v73_v25 = vsel %vm72_vm2, %v71_v24, 0.0 }
 0x144   :  { %74 = vadd.xlane.f32.xlu1 %v73_v25 }
 0x148   :  { %88 = vadd.xlane.f32.xlu1 %v87_v26 }
 0x1d1   :  { %v75_v27 = vpop.xlane.xlu1 %74 }
 0x1d2   :  { %v76_v28 = vrot.slane %v75_v27, 4 }
 0x1d4   :  { %v77_v29 = vadd.f32 %v76_v28, %v75_v27 }
 0x1d5   :  { %v89_v30 = vpop.xlane.xlu1 %88 }
 0x1d6   :  { %v78_v31 = vrot.slane %v77_v29, 2  ;;  %v90_v32 = vrot.slane %v89_v30, 4 }
 0x1d8   :  { %v91_v33 = vadd.f32 %v90_v32, %v89_v30  ;;  %v79_v34 = vadd.f32 %v78_v31, %v77_v29 }
 0x1da   :  { %v92_v35 = vrot.slane %v91_v33, 2  ;;  %v80_v36 = vrot.slane %v79_v34, 1 }
 0x1dc   :  { %v93_v37 = vadd.f32 %v92_v35, %v91_v33  ;;  %v81_v38 = vadd.f32 %v80_v36, %v79_v34 }
 0x1de   :  { %127 = vpush %v81_v38  ;;  %v94_v39 = vrot.slane %v93_v37, 1 }
 0x1e0   :  { %v95_v40 = vadd.f32 %v94_v39, %v93_v37 }
 0x1e2   :  { %129 = vpush %v95_v40 }
 0x20f   :  { %s128_s1 = spop %127 }
 0x213   :  { %s130_s2 = spop %129 }
 0x214   :  { %v105_v41 = vstv %s130_s2 }
 0x215   :  { %140 = vrcp.f32 %v105_v41 }
 0x21f   :  { %v141_v42 = vpop.eup %140 }
 0x220   :  { %131 = vpush %v141_v42 }
 0x251   :  { %s132_s17 = spop %131 }
 0x252   :  { %s108_s18 = smul.f32 %s132_s17, %s128_s1 }
 0x254   :  { %110 = sst [smem:[#allocation3]] %s108_s18 }
 0x255   :  { %151 = shalt.err (!%p148_p2)
}
 0x256   :  { %s155_s26 = smov [#allocation3]  }
 0x257   :  { %118 = dma.smem_to_hbm %s155_s26, 16, %s204_s3, [#allocation4]  }
 0x258   :  { %152 = dma.done.wait [#allocation4], 16  }
 0x259   :  { %153 = vsyncadd [#allocation4], 4294967280 }
 0x25a   :  { %122 = sfence }
 0x25b   :  { %123 = vsyncpa [#allocation4], 1 }

</bundles_post_ra>
